<compile_context>
chip_gen: v5e
topology: v5e:2x2
jax: 0.10.0
libtpu: 0.0.40
codegen_flags: <defaults>
</compile_context>

<pallas_src>
import math

import jax
import jax.numpy as jnp
from jax.experimental import pallas as pl
from jax.experimental.pallas import tpu as pltpu

_LANE = 128
_VMEM_LIMIT = 48 * 1024 * 1024  # fits v7x (64 MiB physical) with headroom


def _round_up(x, m):
    return ((x + m - 1) // m) * m


def _pick_tile(n_pad, desired):
    """Largest multiple of 128 that is <= desired and divides n_pad."""
    t = min(desired, n_pad)
    t = (t // _LANE) * _LANE
    while t > _LANE and n_pad % t != 0:
        t -= _LANE
    return max(t, _LANE)


def _pad2d(x, rows, cols):
    r, c = x.shape
    return jnp.pad(x, ((0, rows - r), (0, cols - c)))


# ---------------------------------------------------------------------------
# Stage 1: support = X @ W   (computed once, row-tiled over N)
# ---------------------------------------------------------------------------
def _support_kernel(x_ref, w_ref, o_ref):
    o_ref[...] = jnp.dot(
        x_ref[...], w_ref[...], preferred_element_type=jnp.float32
    ).astype(o_ref.dtype)


# ---------------------------------------------------------------------------
# Stage 2: out = [prior *] (A @ support) [+ bias], K-tiled accumulation
# ---------------------------------------------------------------------------
def _make_agg_kernel(use_prior, use_bias):
    def kernel(*refs):
        it = iter(refs)
        a_ref = next(it)
        s_ref = next(it)
        prior_ref = next(it) if use_prior else None
        bias_ref = next(it) if use_bias else None
        o_ref = next(it)
        acc_ref = next(it)

        k = pl.program_id(1)

        @pl.when(k == 0)
        def _():
            acc_ref[...] = jnp.zeros_like(acc_ref)

        acc_ref[...] += jnp.dot(
            a_ref[...], s_ref[...], preferred_element_type=jnp.float32
        )

        @pl.when(k == pl.num_programs(1) - 1)
        def _():
            out = acc_ref[...]
            if use_prior:
                out = prior_ref[...] * out
            if use_bias:
                out = out + bias_ref[...]
            o_ref[...] = out.astype(o_ref.dtype)

    return kernel


def graph_convolution(x, w, adjacency, prior, bias=None, *, tile_n=512, tile_k=512):
    """Pallas implementation of GraphConvolution.forward.

    x: (N, F_in) float32, w: (F_in, F_out), adjacency: (N, N) dense,
    prior: (N, P), bias: (F_out,) or None.
    """
    N, F_in = x.shape
    F_in_w, F_out = w.shape
    assert F_in == F_in_w
    assert adjacency.shape == (N, N)

    use_prior = (F_out == prior.shape[1])  # static shape check, as in PyTorch
    use_bias = bias is not None

    N_pad = _round_up(N, _LANE)
    F_in_pad = _round_up(F_in, _LANE)
    F_out_pad = _round_up(F_out, _LANE)

    tn = _pick_tile(N_pad, tile_n)
    tk = _pick_tile(N_pad, tile_k)

    x_p = _pad2d(x.astype(jnp.float32), N_pad, F_in_pad)
    w_p = _pad2d(w.astype(jnp.float32), F_in_pad, F_out_pad)
    # bf16 halves the dominant N^2 HBM traffic; exact for 0/1 adjacency masks.
    a_p = _pad2d(adjacency, N_pad, N_pad).astype(jnp.bfloat16)

    # --- Stage 1: support = X @ W (once) --------------------------------
    support = pl.pallas_call(
        _support_kernel,
        out_shape=jax.ShapeDtypeStruct((N_pad, F_out_pad), jnp.bfloat16),
        grid=(N_pad // tn,),
        in_specs=[
            pl.BlockSpec((tn, F_in_pad), lambda i: (i, 0)),
            pl.BlockSpec((F_in_pad, F_out_pad), lambda i: (0, 0)),
        ],
        out_specs=pl.BlockSpec((tn, F_out_pad), lambda i: (i, 0)),
        compiler_params=pltpu.CompilerParams(
            dimension_semantics=("parallel",),
            vmem_limit_bytes=_VMEM_LIMIT,
        ),
    )(x_p, w_p)

    # --- Stage 2: out = [prior *] (A @ support) [+ bias] -----------------
    operands = [a_p, support]
    in_specs = [
        pl.BlockSpec((tn, tk), lambda i, k: (i, k)),
        pl.BlockSpec((tk, F_out_pad), lambda i, k: (k, 0)),
    ]
    if use_prior:
        prior_p = _pad2d(prior.astype(jnp.float32), N_pad, F_out_pad)
        operands.append(prior_p)
        in_specs.append(pl.BlockSpec((tn, F_out_pad), lambda i, k: (i, 0)))
    if use_bias:
        bias_p = _pad2d(bias.reshape(1, F_out).astype(jnp.float32), 1, F_out_pad)
        operands.append(bias_p)
        in_specs.append(pl.BlockSpec((1, F_out_pad), lambda i, k: (0, 0)))

    out_p = pl.pallas_call(
        _make_agg_kernel(use_prior, use_bias),
        out_shape=jax.ShapeDtypeStruct((N_pad, F_out_pad), jnp.float32),
        grid=(N_pad // tn, N_pad // tk),
        in_specs=in_specs,
        out_specs=pl.BlockSpec((tn, F_out_pad), lambda i, k: (i, 0)),
        scratch_shapes=[pltpu.VMEM((tn, F_out_pad), jnp.float32)],
        compiler_params=pltpu.CompilerParams(
            dimension_semantics=("parallel", "arbitrary"),
            vmem_limit_bytes=_VMEM_LIMIT,
        ),
    )(*operands)

    return out_p[:N, :F_out]


if __name__ == "__main__":
    # Small deterministic example; prior has F_out columns -> prior-gating branch.
    N, F_in, F_out = 256, 64, 32
    key = jax.random.PRNGKey(0)
    k_x, k_w, k_a, k_p, k_b = jax.random.split(key, 5)

    # Parameters: uniform(-stdv, stdv), stdv = 1/sqrt(output_dim), as in reset_parameters().
    stdv = 1.0 / math.sqrt(F_out)
    w = jax.random.uniform(k_w, (F_in, F_out), jnp.float32, minval=-stdv, maxval=stdv)
    bias = jax.random.uniform(k_b, (F_out,), jnp.float32, minval=-stdv, maxval=stdv)

    # Inputs.
    x = jax.random.normal(k_x, (N, F_in), jnp.float32)
    # Sparse-ish symmetric 0/1 adjacency with self loops, densified.
    a_raw = (jax.random.uniform(k_a, (N, N)) < 0.1).astype(jnp.float32)
    adjacency = jnp.clip(a_raw + a_raw.T + jnp.eye(N, dtype=jnp.float32), 0.0, 1.0)
    prior = jax.random.uniform(k_p, (N, F_out), jnp.float32)

    # Small tiles so the K-tiled accumulation path (grid 2x2) is exercised.
    out = graph_convolution(x, w, adjacency, prior, bias, tile_n=128, tile_k=128)
    out = jax.block_until_ready(out)

    # Reference (plain JAX, f32) — tolerance accounts for bf16 support/adjacency.
    ref = prior * (adjacency @ (x @ w)) + bias
    assert out.shape == ref.shape
    assert jnp.allclose(out, ref, atol=1e-1, rtol=1e-2), "mismatch vs reference"
    print("KERNEL_OK")
</pallas_src>

<mosaic_0001>
module attributes {stable_mosaic.version = 11 : i64} {
  func.func @_support_kernel(%arg0: i32, %arg1: memref<128x128xf32, #tpu.memory_space<vmem>>, %arg2: memref<128x128xf32, #tpu.memory_space<vmem>>, %arg3: memref<128x128xbf16, #tpu.memory_space<vmem>>) attributes {dimension_semantics = [#tpu.dimension_semantics<parallel>], iteration_bounds = array<i64: 2>, scalar_prefetch = 0 : i64, scratch_operands = 0 : i64, tpu.core_type = #tpu.core_type<tc>, window_params = [{transform_indices = @transform_0, window_bounds = array<i64: 128, 128>}, {pipeline_mode = #tpu.pipeline_mode<synchronous>, transform_indices = @transform_1, window_bounds = array<i64: 128, 128>}, {transform_indices = @transform_2, window_bounds = array<i64: 128, 128>}]} {
    %c0 = arith.constant 0 : index
    %c0_0 = arith.constant 0 : index
    %0 = vector.load %arg1[%c0, %c0_0] : memref<128x128xf32, #tpu.memory_space<vmem>>, vector<128x128xf32>
    %c0_1 = arith.constant 0 : index
    %c0_2 = arith.constant 0 : index
    %1 = vector.load %arg2[%c0_1, %c0_2] : memref<128x128xf32, #tpu.memory_space<vmem>>, vector<128x128xf32>
    %cst = arith.constant dense<0.000000e+00> : vector<128x128xf32>
    %2 = tpu.matmul %0, %1, %cst {dimension_numbers = #tpu.dot_dimension_numbers<[1], [0], [0], [1], [0, 0, 1, 1], [], []>} : vector<128x128xf32>, vector<128x128xf32>, vector<128x128xf32> -> vector<128x128xf32>
    %3 = arith.truncf %2 : vector<128x128xf32> to vector<128x128xbf16>
    %c0_3 = arith.constant 0 : index
    %c0_4 = arith.constant 0 : index
    %4 = vector.load %arg3[%c0_3, %c0_4] : memref<128x128xbf16, #tpu.memory_space<vmem>>, vector<128x128xbf16>
    tpu.vector_store %arg3[%c0_3, %c0_4], %3 {strides = array<i32>} : memref<128x128xbf16, #tpu.memory_space<vmem>>, vector<128x128xbf16>,
    return
  }
  func.func @transform_0(%arg0: i32) -> (i32, i32) {
    %c0_i32 = arith.constant 0 : i32
    %c0_i32_0 = arith.constant 0 : i32
    return %arg0, %c0_i32 : i32, i32
  }
  func.func @transform_1(%arg0: i32) -> (i32, i32) {
    %c0_i32 = arith.constant 0 : i32
    %c0_i32_0 = arith.constant 0 : i32
    %c0_i32_1 = arith.constant 0 : i32
    return %c0_i32, %c0_i32_0 : i32, i32
  }
  func.func @transform_2(%arg0: i32) -> (i32, i32) {
    %c0_i32 = arith.constant 0 : i32
    %c0_i32_0 = arith.constant 0 : i32
    return %arg0, %c0_i32 : i32, i32
  }
}

</mosaic_0001>

<bundles_post_ra>
// kernel: tpu_custom_call.1
= control target key start
LH: loop header
LB: loop body
LE: loop exit
PB: predicated region body
PF: predicated region fallthrough
CT: control target
= control target key end

     0   :  { %7 = vsyncpa [#allocation3], 0  ;;  %s900_s0 = inlined_call_operand.hbm [shape: f32[256,128], index: 0, kind: input, shape index: {}]   ;;  %s901_s1 = inlined_call_operand.hbm [shape: f32[128,128], index: 1, kind: input, shape index: {}]   ;;  %s902_s2 = inlined_call_operand.hbm [shape: bf16[256,128], index: 2, kind: output, shape index: {}]  }
   0x1   :  { %9 = vsyncpa [#allocation3 + $0x1], 0 }
   0x2   :  { %10 = vsyncpa [#allocation6], 0 }
   0x3   :  { %11 = vsyncpa [#allocation4], 0 }
   0x4   :  { %13 = vsyncpa [#allocation4 + $0x1], 0  ;;  %s737_s9 = smov 0   ;;  %s739_s10 = smov 0  }
   0x5   :  { %s741_s11 = smov 0   ;;  %s743_s12 = smov 0  }
   0x6 LB: > { %s758_s13 = sadd.s32 4294967295, %s715_s12   ;;  %s411_s14 = sadd.s32 4294967294, %s715_s12   ;;  %s715_s12 = sphi %s743_s12, %s912_s12   ;;  %s711_s11 = sphi %s741_s11, %s911_s11   ;;  %s707_s10 = sphi %s739_s10, %s910_s10   ;;  %s703_s9 = sphi %s737_s9, %s909_s9  }
   0x7   : > { %p39_p0 = scmp.ne.s32.totalorder %s707_s10, %s703_s9  ;;  %p40_p1 = scmp.eq.s32.totalorder %s758_s13, 0 }
   0x8   : > { %p84_p2 = scmp.eq.s32.totalorder %s758_s13, 1  ;;  %p90_p3 = scmp.eq.s32.totalorder %s411_s14, 1 }
   0x9   : > { %p767_p4 = por %p40_p1, %p39_p0  ;;  %p412_p5 = scmp.ge.s32.totalorder %s715_s12, 1 }
   0xa   : > { %p772_p6 = por %p90_p3, %p39_p0  ;;  %p97_p7 = scmp.lt.s32.totalorder %s715_s12, 3 }
   0xb   : > { %s108_s19 = sshll.u32 %s901_s1, 4  ;;  %s717_s21 = smov [#allocation5]   ;;  %s109_s19 = int_to_ptr.hbm [resolvable:$true] %s108_s19 }
   0xc   : > { %p780_p8 = pnand %p412_p5, %p97_p7  ;;  %s110_s22 = sshll.u32 %s717_s21, 4  ;;  %s111_s22 = int_to_ptr.vmem [resolvable:$true] %s110_s22 }
   0xd   : > { %s790_s23 = sadd.s32 1, %s715_s12   ;;  %s718_s24 = smov 128  }
   0xe   : > { %p532_p9 = pneg %p780_p8  ;;  %s719_s25 = smov 8  }
   0xf   : > { %s23_s26 = ssub.s32 %s715_s12, %s790_s23  ;;  %s26_s27 = sadd.s32 1, %s711_s11 }
  0x10   : > { %p533_p10 = pnand %p532_p9, %p40_p1  ;;  %p24_p12 = scmp.eq.s32.totalorder %s23_s26, 0 }
  0x11   : > { %p33_p13 = scmp.ne.s32.totalorder %s711_s11, %s707_s10  ;;  %p34_p0 = scmp.eq.s32.totalorder %s715_s12, 0 }
  0x12   : > { %535 = dma.hbm_to_vmem [thread:$0]  (!%p533_p10), %s109_s19, 2048, %s111_s22, [#allocation6], %s718_s24, %s718_s24, %s719_s25  }
  0x13   : > { %s802_s28 = scalar_select %p24_p12, %s711_s11, %s26_s27  }
  0x14   : > { %p806_p3 = por %p84_p2, %p33_p13  ;;  %p545_p5 = scmp.lt.s32.totalorder %s715_s12, 2 }
  0x15   : > { %s124_s30 = sand.u32 1, %s711_s11   ;;  %s427_s3 = sshll.u32 %s715_s12, 7 }
  0x16   : > { %p35_p7 = por %p34_p0, %p33_p13  ;;  %s415_s4 = sshll.u32 %s124_s30, 7 }
  0x17   : > { %s133_s7 = scalar_lea.hbm %s900_s0, %s427_s3  ;;  %s128_s14 = scalar_lea.vmem [#allocation2], %s415_s4 }
  0x18   : > { %s134_s8 = sshll.u32 %s133_s7, 4  ;;  %s136_s17 = sshll.u32 %s128_s14, 4  ;;  %s135_s8 = int_to_ptr.hbm [resolvable:$true] %s134_s8  ;;  %s137_s17 = int_to_ptr.vmem [resolvable:$true] %s136_s17 }
  0x19   : > { %p816_p9 = pnand %p545_p5, %p35_p7  ;;  %s125_s19 = scalar_lea.sflag [#allocation3], %s124_s30 }
  0x1a   : > { %s615_s21 = sshra.s32 %s135_s8, 4  ;;  %s622_s3 = scalar_lea.hbm %s900_s0, 256  ;;  %s616_s21 = int_to_ptr.hbm [resolvable:$true] %s615_s21 }
  0x1b   : > { %s617_s22 = scalar_lea.hbm %s616_s21, 128  ;;  %p619_p10 = pneg %p816_p9 }
  0x1c   : > { %p618_p2 = scmp.ne.s32.totalorder %s616_s21, %s617_s22  ;;  %p623_p0 = scmp.lt.s32.totalorder %s616_s21, %s900_s0 }
  0x1d   : > { %p624_p5 = scmp.lt.s32.totalorder %s622_s3, %s617_s22 }
  0x1e   : > { %p620_p12 = pnand %p619_p10, %p618_p2 }
  0x1f   : > { %p625_p7 = por %p624_p5, %p623_p0 }
  0x20   : > { %p621_p13 = pneg %p620_p12 }
  0x22   : > { %p626_p11 = pnand %p625_p7, %p621_p13 }
  0x24   : > { %629 = shalt.err (!%p626_p11)
}
  0x25   : > { %539 = dma.hbm_to_vmem [thread:$0]  (!%p816_p9), %s135_s8, 2048, %s137_s17, %s125_s19, %s718_s24, %s718_s24, %s719_s25  }
  0x26   : > { %148 = sbr.rel (%p780_p8) target bundleno = 243 (0xf3), region = 28  ;;  %s836_s30 = sand.u32 (!%p780_p8), 1, %s707_s10  }
  0x27   : > { %s419_s6 = sshll.u32 (!%p780_p8), %s836_s30, 7  ;;  %s151_s7 = scalar_lea.sflag (!%p780_p8), [#allocation3], %s836_s30 }
  0x28   : > { %s840_s14 = scalar_lea.vmem (!%p780_p8), [#allocation2], %s419_s6 }
  0x2b   : > { %690 = dma.done.wait (%p767_p4), %s151_s7, 2048  }
  0x2c   : > { %692 = vsyncadd (%p767_p4), %s151_s7, 4294965248 }
  0x2d   : > { %694 = dma.done.wait (%p40_p1), [#allocation6], 2048  }
  0x2e   : > { %696 = vsyncadd (%p40_p1), [#allocation6], 4294965248  ;;  %v214_v0 = vld [vmem:[#allocation5 + $0x78] sm:$0xff]  ;;  %v213_v1 = vld [vmem:[#allocation5 + $0x70] sm:$0xff]  ;;  %s421_s15 = sshll.u32 %s836_s30, 6  ;;  %s428_s24 = sshll.u32 %s758_s13, 6 }
  0x2f   : > { %215 = vmatpush.msra.mxu0 %v214_v0  ;;  %476 = vmatpush.msra.mxu1 %v214_v0  ;;  %v212_v2 = vld [vmem:[#allocation5 + $0x68] sm:$0xff]  ;;  %v211_v3 = vld [vmem:[#allocation5 + $0x60] sm:$0xff]  ;;  %v210_v4 = vld [vmem:[#allocation5 + $0x58] sm:$0xff]  ;;  %s180_s20 = scalar_lea.vmem [#allocation7], %s421_s15  ;;  %s324_s17 = scalar_lea.hbm %s902_s2, %s428_s24 }
  0x30   : > { %477 = vmatpush.msra.mxu2 %v214_v0  ;;  %478 = vmatpush.msra.mxu3 %v214_v0  ;;  %v209_v5 = vld [vmem:[#allocation5 + $0x50] sm:$0xff]  ;;  %v208_v6 = vld [vmem:[#allocation5 + $0x48] sm:$0xff]  ;;  %v207_v7 = vld [vmem:[#allocation5 + $0x40] sm:$0xff]  ;;  %s325_s18 = sshll.u32 %s180_s20, 4  ;;  %s327_s19 = sshll.u32 %s324_s17, 4  ;;  %s326_s18 = int_to_ptr.vmem [resolvable:$true] %s325_s18  ;;  %s328_s19 = int_to_ptr.hbm [resolvable:$true] %s327_s19 }
  0x31   : > { %216 = vmatpush.msra.mxu0 %v213_v1  ;;  %479 = vmatpush.msra.mxu1 %v213_v1  ;;  %v206_v8 = vld [vmem:[#allocation5 + $0x38] sm:$0xff]  ;;  %v205_v9 = vld [vmem:[#allocation5 + $0x30] sm:$0xff]  ;;  %v204_v10 = vld [vmem:[#allocation5 + $0x28] sm:$0xff]  ;;  %s313_s13 = scalar_lea.sflag [#allocation4], %s836_s30  ;;  %s659_s21 = sshra.s32 %s328_s19, 4  ;;  %s660_s21 = int_to_ptr.hbm [resolvable:$true] %s659_s21 }
  0x32   : > { %480 = vmatpush.msra.mxu2 %v213_v1  ;;  %481 = vmatpush.msra.mxu3 %v213_v1  ;;  %v203_v11 = vld [vmem:[#allocation5 + $0x20] sm:$0xff]  ;;  %v202_v12 = vld [vmem:[#allocation5 + $0x18] sm:$0xff]  ;;  %v201_v13 = vld [vmem:[#allocation5 + $0x10] sm:$0xff]  ;;  %s661_s22 = scalar_lea.hbm %s660_s21, 64  ;;  %s665_s3 = scalar_lea.hbm %s902_s2, 128 }
  0x33   : > { %217 = vmatpush.msra.mxu0 %v212_v2  ;;  %482 = vmatpush.msra.mxu1 %v212_v2  ;;  %v200_v14 = vld [vmem:[#allocation5 + $0x8] sm:$0xff]  ;;  %v199_v15 = vld [vmem:[#allocation5] sm:$0xff]  ;;  %v185_v24 = vld [vmem:[%s840_s14 + $0x10] sm:$0xff]  ;;  %p662_p1 = scmp.ne.s32.totalorder %s660_s21, %s661_s22  ;;  %p666_p11 = scmp.lt.s32.totalorder %s660_s21, %s902_s2 }
  0x34   : > { %483 = vmatpush.msra.mxu2 %v212_v2  ;;  %484 = vmatpush.msra.mxu3 %v212_v2  ;;  %v183_v16 = vld [vmem:[%s840_s14] sm:$0xff]  ;;  %v184_v20 = vld [vmem:[%s840_s14 + $0x8] sm:$0xff]  ;;  %v189_v25 = vld [vmem:[%s840_s14 + $0x30] sm:$0xff]  ;;  %p667_p9 = scmp.lt.s32.totalorder %s665_s3, %s661_s22 }
  0x35   : > { %218 = vmatpush.msra.mxu0 %v211_v3  ;;  %485 = vmatpush.msra.mxu1 %v211_v3  ;;  %v187_v17 = vld [vmem:[%s840_s14 + $0x20] sm:$0xff]  ;;  %v188_v21 = vld [vmem:[%s840_s14 + $0x28] sm:$0xff]  ;;  %v193_v26 = vld [vmem:[%s840_s14 + $0x50] sm:$0xff]  ;;  %p663_p4 = pnand %p662_p1, %p806_p3 }
  0x36   : > { %486 = vmatpush.msra.mxu2 %v211_v3  ;;  %487 = vmatpush.msra.mxu3 %v211_v3  ;;  %v191_v18 = vld [vmem:[%s840_s14 + $0x40] sm:$0xff]  ;;  %v192_v22 = vld [vmem:[%s840_s14 + $0x48] sm:$0xff]  ;;  %v197_v27 = vld [vmem:[%s840_s14 + $0x70] sm:$0xff]  ;;  %p668_p2 = por %p667_p9, %p666_p11 }
  0x37   : > { %219 = vmatpush.msra.mxu0 %v210_v4  ;;  %488 = vmatpush.msra.mxu1 %v210_v4  ;;  %v195_v19 = vld [vmem:[%s840_s14 + $0x60] sm:$0xff]  ;;  %v196_v23 = vld [vmem:[%s840_s14 + $0x68] sm:$0xff]  ;;  %v186_v28 = vld [vmem:[%s840_s14 + $0x18] sm:$0xff]  ;;  %p664_p8 = pneg %p663_p4 }
  0x38   : > { %489 = vmatpush.msra.mxu2 %v210_v4  ;;  %490 = vmatpush.msra.mxu3 %v210_v4  ;;  %v190_v29 = vld [vmem:[%s840_s14 + $0x38] sm:$0xff] }
  0x39   : > { %220 = vmatpush.msra.mxu0 %v209_v5  ;;  %491 = vmatpush.msra.mxu1 %v209_v5  ;;  %v194_v30 = vld [vmem:[%s840_s14 + $0x58] sm:$0xff]  ;;  %p669_p10 = pnand %p668_p2, %p664_p8 }
  0x3a   : > { %492 = vmatpush.msra.mxu2 %v209_v5  ;;  %493 = vmatpush.msra.mxu3 %v209_v5  ;;  %v198_v31 = vld [vmem:[%s840_s14 + $0x78] sm:$0xff] }
  0x3b   : > { %221 = vmatpush.msra.mxu0 %v208_v6  ;;  %494 = vmatpush.msra.mxu1 %v208_v6 }
  0x3c   : > { %495 = vmatpush.msra.mxu2 %v208_v6  ;;  %496 = vmatpush.msra.mxu3 %v208_v6 }
  0x3d   : > { %222 = vmatpush.msra.mxu0 %v207_v7  ;;  %497 = vmatpush.msra.mxu1 %v207_v7 }
  0x3e   : > { %498 = vmatpush.msra.mxu2 %v207_v7  ;;  %499 = vmatpush.msra.mxu3 %v207_v7 }
  0x3f   : > { %223 = vmatpush.msra.mxu0 %v206_v8  ;;  %500 = vmatpush.msra.mxu1 %v206_v8 }
  0x40   : > { %501 = vmatpush.msra.mxu2 %v206_v8  ;;  %502 = vmatpush.msra.mxu3 %v206_v8 }
  0x41   : > { %224 = vmatpush.msra.mxu0 %v205_v9  ;;  %503 = vmatpush.msra.mxu1 %v205_v9 }
  0x42   : > { %504 = vmatpush.msra.mxu2 %v205_v9  ;;  %505 = vmatpush.msra.mxu3 %v205_v9 }
  0x43   : > { %225 = vmatpush.msra.mxu0 %v204_v10  ;;  %506 = vmatpush.msra.mxu1 %v204_v10 }
  0x44   : > { %507 = vmatpush.msra.mxu2 %v204_v10  ;;  %508 = vmatpush.msra.mxu3 %v204_v10 }
  0x45   : > { %226 = vmatpush.msra.mxu0 %v203_v11  ;;  %509 = vmatpush.msra.mxu1 %v203_v11 }
  0x46   : > { %510 = vmatpush.msra.mxu2 %v203_v11  ;;  %511 = vmatpush.msra.mxu3 %v203_v11 }
  0x47   : > { %227 = vmatpush.msra.mxu0 %v202_v12  ;;  %512 = vmatpush.msra.mxu1 %v202_v12 }
  0x48   : > { %513 = vmatpush.msra.mxu2 %v202_v12  ;;  %514 = vmatpush.msra.mxu3 %v202_v12 }
  0x49   : > { %228 = vmatpush.msra.mxu0 %v201_v13  ;;  %515 = vmatpush.msra.mxu1 %v201_v13 }
  0x4a   : > { %516 = vmatpush.msra.mxu2 %v201_v13  ;;  %517 = vmatpush.msra.mxu3 %v201_v13 }
  0x4b   : > { %229 = vmatpush.msra.mxu0 %v200_v14  ;;  %518 = vmatpush.msra.mxu1 %v200_v14 }
  0x4c   : > { %519 = vmatpush.msra.mxu2 %v200_v14  ;;  %520 = vmatpush.msra.mxu3 %v200_v14 }
  0x4d   : > { %230 = vmatpush.msra.mxu0 %v199_v15  ;;  %521 = vmatpush.msra.mxu1 %v199_v15 }
  0x4e   : > { %522 = vmatpush.msra.mxu2 %v199_v15  ;;  %523 = vmatpush.msra.mxu3 %v199_v15 }
  0x4f   : > { %231 = vmatmul.f32.vlgmr.msra.gmra.mxu0 %v183_v16  ;;  %243 = vmatmul.f32.vlgmr.msra.gmra.mxu1 %v187_v17 }
  0x50   : > { %255 = vmatmul.f32.vlgmr.msra.gmra.mxu2 %v191_v18  ;;  %267 = vmatmul.f32.vlgmr.msra.gmra.mxu3 %v195_v19 }
  0x57   : > { %234 = vmatmul.f32.gmra.mxu0 %v184_v20  ;;  %246 = vmatmul.f32.gmra.mxu1 %v188_v21 }
  0x58   : > { %258 = vmatmul.f32.gmra.mxu2 %v192_v22  ;;  %270 = vmatmul.f32.gmra.mxu3 %v196_v23 }
  0x5f   : > { %237 = vmatmul.f32.gmra.mxu0 %v185_v24  ;;  %249 = vmatmul.f32.gmra.mxu1 %v189_v25 }
  0x60   : > { %261 = vmatmul.f32.gmra.mxu2 %v193_v26  ;;  %273 = vmatmul.f32.gmra.mxu3 %v197_v27 }
  0x67   : > { %240 = vmatmul.f32.gmra.mxu0 %v186_v28  ;;  %252 = vmatmul.f32.gmra.mxu1 %v190_v29 }
  0x68   : > { %264 = vmatmul.f32.gmra.mxu2 %v194_v30  ;;  %276 = vmatmul.f32.gmra.mxu3 %v198_v31 }
  0xcc   : > { %v232_v32 = vpop.f32.mrf.mxu0  ;;  %v244_v33 = vpop.f32.mrf.mxu1 }
  0xd3   : > { %v256_v34 = vpop.f32.mrf.mxu2  ;;  %v268_v35 = vpop.f32.mrf.mxu3 }
  0xd4   : > { %v235_v36 = vpop.f32.mrf.mxu0  ;;  %v247_v37 = vpop.f32.mrf.mxu1 }
  0xd5   : > { %v432_v38 = vpack.c.bf16 %v235_v36, %v232_v32  ;;  %v442_v39 = vpack.c.bf16 %v247_v37, %v244_v33 }
  0xd7   : > { %433 = vst [vmem:[%s180_s20] sm:$0xff] %v432_v38  }
  0xd8   : > { %470 = vst [vmem:[%s180_s20 + $0x10] sm:$0xff] %v442_v39  }
  0xdb   : > { %v259_v40 = vpop.f32.mrf.mxu2  ;;  %v271_v41 = vpop.f32.mrf.mxu3 }
  0xdc   : > { %v452_v42 = vpack.c.bf16 %v259_v40, %v256_v34  ;;  %v462_v43 = vpack.c.bf16 %v271_v41, %v268_v35  ;;  %v238_v44 = vpop.f32.mrf.mxu0  ;;  %v250_v45 = vpop.f32.mrf.mxu1 }
  0xde   : > { %472 = vst [vmem:[%s180_s20 + $0x20] sm:$0xff] %v452_v42  }
  0xdf   : > { %474 = vst [vmem:[%s180_s20 + $0x30] sm:$0xff] %v462_v43  }
  0xe3   : > { %v262_v46 = vpop.f32.mrf.mxu2  ;;  %v274_v47 = vpop.f32.mrf.mxu3 }
  0xe4   : > { %v241_v48 = vpop.f32.mrf.mxu0  ;;  %v253_v49 = vpop.f32.mrf.mxu1 }
  0xe5   : > { %v437_v50 = vpack.c.bf16 %v241_v48, %v238_v44  ;;  %v447_v51 = vpack.c.bf16 %v253_v49, %v250_v45 }
  0xe7   : > { %469 = vst [vmem:[%s180_s20 + $0x8] sm:$0xff] %v437_v50  }
  0xe8   : > { %471 = vst [vmem:[%s180_s20 + $0x18] sm:$0xff] %v447_v51  }
  0xeb   : > { %v265_v52 = vpop.f32.mrf.mxu2  ;;  %v277_v53 = vpop.f32.mrf.mxu3 }
  0xec   : > { %v457_v54 = vpack.c.bf16 %v265_v52, %v262_v46  ;;  %v467_v55 = vpack.c.bf16 %v277_v53, %v274_v47 }
  0xee   : > { %473 = vst [vmem:[%s180_s20 + $0x28] sm:$0xff] %v457_v54  }
  0xef   : > { %475 = vst [vmem:[%s180_s20 + $0x38] sm:$0xff] %v467_v55  }
  0xf0   : > { %672 = shalt.err (!%p669_p10)
}
  0xf1   : > { %s720_s30 = smov 64   ;;  %s721_s6 = smov 4  }
  0xf2   : > { %530 = dma.vmem_to_hbm [thread:$0]  (%p806_p3), %s326_s18, 1024, %s328_s19, %s313_s13, %s720_s30, %s720_s30, %s721_s6  }
  0xf3 PF: > { %s342_s7 = sand.u32 1, %s703_s9   ;;  %p908_p12 = scmp.ge.s32.totalorder %s715_s12, 2 }
  0xf4   : > { %s343_s14 = scalar_lea.sflag [#allocation4], %s342_s7 }
  0xf5   : > { %p541_p13 = pnand %p908_p12, %p772_p6 }
  0xf7   : > { %p542_p0 = pneg %p541_p13 }
  0xf9   : > { %698 = dma.done.wait (%p542_p0), %s343_s14, 1024  }
  0xfa   : > { %700 = vsyncadd (%p542_p0), %s343_s14, 4294966272  ;;  %p16_p5 = scmp.ge.s32.totalorder %s790_s23, 4   ;;  %s909_s9 = smov %s707_s10 }
  0xfb   : > { %s910_s10 = smov %s711_s11  ;;  %s911_s11 = smov %s802_s28 }
  0xfc   : > { %s912_s12 = smov %s790_s23  ;;  %18 = sbr.rel (!%p16_p5) target bundleno = 6 (0x6), region = 77 }
 0x101   :  { %349 = vsyncpa [#allocation3], 1 }
 0x102   :  { %351 = vsyncpa [#allocation3 + $0x1], 1 }
 0x103   :  { %352 = vsyncpa [#allocation6], 1 }
 0x104   :  { %353 = vsyncpa [#allocation4], 1 }
 0x105   :  { %355 = vsyncpa [#allocation4 + $0x1], 1 }

</bundles_post_ra>
